<compile_context>
chip_gen: v6e
topology: v6e:2x2x1
jax: 0.10.0
libtpu: 0.0.40
codegen_flags: <defaults>
</compile_context>

<pallas_src>
import jax
import jax.numpy as jnp
import numpy as np
from jax.experimental import pallas as pl
from jax.experimental.pallas import tpu as pltpu


# ----------------------------------------------------------------------------
# Kernel bodies
# ----------------------------------------------------------------------------
def _epilogue(z, wo_ref, b2_ref, out_ref):
    out = jnp.dot(wo_ref[...], z, preferred_element_type=jnp.float32)
    out = jnp.maximum(out + b2_ref[...], 0.0)
    out_ref[0] = out.astype(out_ref.dtype)


def _make_tiled_kernel(shift, has_h):
    """Tiled path: one (batch, T-tile j) block per grid step.

    x (and h) arrive twice: T block j ("cur") and T block min(j+1, last)
    ("nxt").  The right window for this tile,
        x[:, j*tt + shift : j*tt + shift + tt],
    is rebuilt as concat(cur[:, shift:], nxt[:, :shift])  (shift < tt).
    Columns of that window that fall past t_eff = T - shift (or come from the
    clamped duplicate block on the edge tile) only feed output columns that
    Pallas masks when writing back the partial edge output tile, because each
    output column depends solely on its own input column.
    """
    if has_h:
        def kernel(xc_ref, xn_ref, hc_ref, hn_ref,
                   wxl_ref, wxr_ref, whl_ref, whr_ref, wo_ref,
                   b1_ref, b2_ref, out_ref):
            xc, xn = xc_ref[0], xn_ref[0]
            hc, hn = hc_ref[0], hn_ref[0]
            x_r = jnp.concatenate([xc[:, shift:], xn[:, :shift]], axis=-1)
            h_r = jnp.concatenate([hc[:, shift:], hn[:, :shift]], axis=-1)
            z = jnp.dot(wxl_ref[...], xc, preferred_element_type=jnp.float32)
            z = z + jnp.dot(wxr_ref[...], x_r, preferred_element_type=jnp.float32)
            z = z + jnp.dot(whl_ref[...], hc, preferred_element_type=jnp.float32)
            z = z + jnp.dot(whr_ref[...], h_r, preferred_element_type=jnp.float32)
            z = jnp.maximum(z + b1_ref[...], 0.0).astype(wo_ref.dtype)
            _epilogue(z, wo_ref, b2_ref, out_ref)
    else:
        def kernel(xc_ref, xn_ref, wxl_ref, wxr_ref, wo_ref,
                   b1_ref, b2_ref, out_ref):
            xc, xn = xc_ref[0], xn_ref[0]
            x_r = jnp.concatenate([xc[:, shift:], xn[:, :shift]], axis=-1)
            z = jnp.dot(wxl_ref[...], xc, preferred_element_type=jnp.float32)
            z = z + jnp.dot(wxr_ref[...], x_r, preferred_element_type=jnp.float32)
            z = jnp.maximum(z + b1_ref[...], 0.0).astype(wo_ref.dtype)
            _epilogue(z, wo_ref, b2_ref, out_ref)
    return kernel


def _make_full_kernel(shift, t_eff, has_h):
    """Small-input path: whole T extent is one block; shifted windows are
    static slices of the resident tile (any shift value supported)."""
    if has_h:
        def kernel(x_ref, h_ref, wxl_ref, wxr_ref, whl_ref, whr_ref, wo_ref,
                   b1_ref, b2_ref, out_ref):
            x = x_ref[0]
            h = h_ref[0]
            z = jnp.dot(wxl_ref[...], x[:, 0:t_eff],
                        preferred_element_type=jnp.float32)
            z = z + jnp.dot(wxr_ref[...], x[:, shift:shift + t_eff],
                            preferred_element_type=jnp.float32)
            z = z + jnp.dot(whl_ref[...], h[:, 0:t_eff],
                            preferred_element_type=jnp.float32)
            z = z + jnp.dot(whr_ref[...], h[:, shift:shift + t_eff],
                            preferred_element_type=jnp.float32)
            z = jnp.maximum(z + b1_ref[...], 0.0).astype(wo_ref.dtype)
            _epilogue(z, wo_ref, b2_ref, out_ref)
    else:
        def kernel(x_ref, wxl_ref, wxr_ref, wo_ref, b1_ref, b2_ref, out_ref):
            x = x_ref[0]
            z = jnp.dot(wxl_ref[...], x[:, 0:t_eff],
                        preferred_element_type=jnp.float32)
            z = z + jnp.dot(wxr_ref[...], x[:, shift:shift + t_eff],
                            preferred_element_type=jnp.float32)
            z = jnp.maximum(z + b1_ref[...], 0.0).astype(wo_ref.dtype)
            _epilogue(z, wo_ref, b2_ref, out_ref)
    return kernel


# ----------------------------------------------------------------------------
# Tile selection (VMEM + megacore aware)
# ----------------------------------------------------------------------------
_VMEM_LIMIT_BYTES = 32 * 1024 * 1024   # raises v5e's 16 MiB scoped default; == v7x default
_VMEM_BUDGET_BYTES = 20 * 1024 * 1024  # target for pipeline buffers + temporaries


def _choose_t_tile(t_tile, shift, t_eff, batch, c_in, c_lc, c_out,
                   in_bytes, out_bytes):
    min_tt = 128 * (shift // 128 + 1)                 # smallest multiple of 128 > shift
    tt = max(min_tt, 128 * max(1, int(t_tile) // 128))
    # v7x: with batch == 1, keep >= 2 grid steps along T so both TCs are used.
    if batch == 1:
        half = 128 * ((t_eff // 2) // 128)
        if half >= min_tt:
            tt = min(tt, half)

    def vmem_bytes(t):
        act = 2 * 2 * (c_in + c_lc) * t * in_bytes    # cur+nxt specs, double buffered
        out = 2 * c_out * t * out_bytes               # output, double buffered
        tmp = 2 * c_out * t * 4 + (c_in + c_lc) * t * in_bytes  # f32 z/out + x_r/h_r copies
        return act + out + tmp

    while tt > min_tt and vmem_bytes(tt) > _VMEM_BUDGET_BYTES:
        tt = max(min_tt, 128 * ((tt // 2) // 128))
    return tt


# ----------------------------------------------------------------------------
# Parameter construction (deterministic; mimics weight_norm(Conv1d(ks=1)))
# ----------------------------------------------------------------------------
def _make_wn_conv1x1_params(key, c_in, c_out):
    """weight_norm parametrization: w = g * v / ||v||, norm over (in, k) dims."""
    kv, kg, kb = jax.random.split(key, 3)
    v = jax.random.normal(kv, (c_out, c_in), dtype=jnp.float32) * 0.5
    g = jax.random.uniform(kg, (c_out,), dtype=jnp.float32, minval=0.5, maxval=1.5)
    b = jax.random.normal(kb, (c_out,), dtype=jnp.float32) * 0.1
    norm = jnp.sqrt(jnp.sum(v * v, axis=1, keepdims=True))
    w = g[:, None] * v / norm
    return w, b


def make_fftnet_params(in_channels, out_channels, local_condition_channels=None, seed=0):
    key = jax.random.PRNGKey(seed)
    keys = jax.random.split(key, 5)
    params = {
        "x_l": _make_wn_conv1x1_params(keys[0], in_channels, out_channels),
        "x_r": _make_wn_conv1x1_params(keys[1], in_channels, out_channels),
        "out": _make_wn_conv1x1_params(keys[4], out_channels, out_channels),
    }
    if local_condition_channels is not None:
        params["h_l"] = _make_wn_conv1x1_params(keys[2], local_condition_channels, out_channels)
        params["h_r"] = _make_wn_conv1x1_params(keys[3], local_condition_channels, out_channels)
    return params


# ----------------------------------------------------------------------------
# Wrapper
# ----------------------------------------------------------------------------
def fftnet_block_forward(x, params, shift, h=None, *, t_tile=1024, out_dtype=None):
    """x: (B, C_in, T) NCW.  Returns (B, C_out, T - shift).

    No wrapper-side copies of the activations: x/h go to the kernel as-is and
    the shifted windows are assembled in VMEM.  Only the tiny weight/bias
    tensors are reshaped/cast on the host.
    """
    B, c_in, T = x.shape
    shift = int(shift)
    if not (0 < shift < T):
        raise ValueError(f"shift must satisfy 0 < shift < T; got shift={shift}, T={T}")
    t_eff = T - shift

    wxl, bxl = params["x_l"]
    wxr, bxr = params["x_r"]
    wo, bo = params["out"]
    c_out = wo.shape[0]
    has_h = h is not None

    cdt = x.dtype                                   # compute dtype follows activations
    out_dtype = jnp.dtype(cdt if out_dtype is None else out_dtype)

    weights = [wxl.astype(cdt), wxr.astype(cdt)]
    b1 = bxl + bxr
    c_lc = 0
    if has_h:
        whl, bhl = params["h_l"]
        whr, bhr = params["h_r"]
        if h.shape[-1] < T:
            raise ValueError("h must have at least as many timesteps as x")
        if h.shape[-1] != T:                        # PyTorch: h[:, :, -x.size(-1):]
            h = h[:, :, h.shape[-1] - T:]
        if h.dtype != cdt:
            h = h.astype(cdt)
        c_lc = h.shape[1]
        weights += [whl.astype(cdt), whr.astype(cdt)]
        b1 = b1 + bhl + bhr
    weights.append(wo.astype(cdt))
    biases = [b1[:, None].astype(jnp.float32), bo[:, None].astype(jnp.float32)]

    in_bytes = jnp.dtype(cdt).itemsize
    out_bytes = out_dtype.itemsize
    tt = _choose_t_tile(t_tile, shift, t_eff, B, c_in, c_lc, c_out,
                        in_bytes, out_bytes)

    if t_eff <= tt:
        # ---- single full-extent T block per batch element -------------------
        kernel = _make_full_kernel(shift, t_eff, has_h)
        grid = (B,)
        dims = ("parallel",)
        act_specs = [pl.BlockSpec((1, c_in, T), lambda b: (b, 0, 0))]
        operands = [x]
        if has_h:
            act_specs.append(pl.BlockSpec((1, c_lc, T), lambda b: (b, 0, 0)))
            operands.append(h)
        const_map = lambda b: (0, 0)
        out_spec = pl.BlockSpec((1, c_out, t_eff), lambda b: (b, 0, 0))
    else:
        # ---- T-tiled pipeline (T innermost, both axes parallel) -------------
        n_t = pl.cdiv(t_eff, tt)                    # >= 2 here
        nbx = pl.cdiv(T, tt)                        # #T-blocks of x/h (T = t_eff + shift)
        kernel = _make_tiled_kernel(shift, has_h)
        grid = (B, n_t)
        dims = ("parallel", "parallel")
        cur = lambda b, j: (b, 0, j)
        # Clamped "next" block.  When the clamp triggers on the edge tile,
        # r + shift <= tt, so every valid output column still reads from the
        # cur[:, shift:] part; the wrapped columns land in the masked region.
        nxt = lambda b, j: (b, 0, jnp.minimum(j + 1, nbx - 1))
        act_specs = [pl.BlockSpec((1, c_in, tt), cur),
                     pl.BlockSpec((1, c_in, tt), nxt)]
        operands = [x, x]
        if has_h:
            act_specs += [pl.BlockSpec((1, c_lc, tt), cur),
                          pl.BlockSpec((1, c_lc, tt), nxt)]
            operands += [h, h]
        const_map = lambda b, j: (0, 0)
        out_spec = pl.BlockSpec((1, c_out, tt), cur)

    in_specs = (act_specs
                + [pl.BlockSpec(w.shape, const_map) for w in weights]
                + [pl.BlockSpec((c_out, 1), const_map)] * 2)
    operands = operands + weights + biases

    return pl.pallas_call(
        kernel,
        out_shape=jax.ShapeDtypeStruct((B, c_out, t_eff), out_dtype),
        grid_spec=pltpu.PrefetchScalarGridSpec(
            num_scalar_prefetch=0, grid=grid,
            in_specs=in_specs, out_specs=out_spec),
        compiler_params=pltpu.CompilerParams(
            dimension_semantics=dims,
            vmem_limit_bytes=_VMEM_LIMIT_BYTES),
    )(*operands)


# ----------------------------------------------------------------------------
# Pure-JAX reference (matches PyTorch semantics) for validation
# ----------------------------------------------------------------------------
def fftnet_block_reference(x, params, shift, h=None):
    def conv1x1(w, b, inp):  # inp: (B, C_in, T) -> (B, C_out, T)
        return jnp.einsum("oc,bct->bot", w, inp) + b[None, :, None]

    wxl, bxl = params["x_l"]
    wxr, bxr = params["x_r"]
    wo, bo = params["out"]
    x_l = conv1x1(wxl, bxl, x[:, :, :-shift])
    x_r = conv1x1(wxr, bxr, x[:, :, shift:])
    if h is None:
        z = jax.nn.relu(x_l + x_r)
    else:
        h = h[:, :, -x.shape[-1]:]
        whl, bhl = params["h_l"]
        whr, bhr = params["h_r"]
        h_l = conv1x1(whl, bhl, h[:, :, :-shift])
        h_r = conv1x1(whr, bhr, h[:, :, shift:])
        z = jax.nn.relu((x_l + x_r) + (h_l + h_r))
    return jax.nn.relu(conv1x1(wo, bo, z))


# ----------------------------------------------------------------------------
# Demo
# ----------------------------------------------------------------------------
if __name__ == "__main__":
    B, C_IN, C_OUT, C_LC, SHIFT = 2, 4, 8, 3, 2

    key = jax.random.PRNGKey(0)
    kx, kh, kx2, kh2, kx3, kh3 = jax.random.split(key, 6)
    params = make_fftnet_params(C_IN, C_OUT, local_condition_channels=C_LC, seed=0)

    # --- small shapes: single full-extent T block ----------------------------
    T = 16
    x = jax.random.normal(kx, (B, C_IN, T), dtype=jnp.float32)
    h = jax.random.normal(kh, (B, C_LC, T + 4), dtype=jnp.float32)  # longer; uses last T

    out_cond = jax.block_until_ready(fftnet_block_forward(x, params, SHIFT, h=h))
    ref_cond = fftnet_block_reference(x, params, SHIFT, h=h)
    np.testing.assert_allclose(np.asarray(out_cond), np.asarray(ref_cond), rtol=1e-5, atol=1e-5)
    assert out_cond.shape == (B, C_OUT, T - SHIFT)

    out_nc = jax.block_until_ready(fftnet_block_forward(x, params, SHIFT, h=None))
    ref_nc = fftnet_block_reference(x, params, SHIFT, h=None)
    np.testing.assert_allclose(np.asarray(out_nc), np.asarray(ref_nc), rtol=1e-5, atol=1e-5)

    # --- longer T: tiled path, masked edge tile + clamped next-block index ---
    T2 = 1100                       # t_eff = 1098 -> tiles 512, 512, 74 (masked)
    x2 = jax.random.normal(kx2, (B, C_IN, T2), dtype=jnp.float32)
    h2 = jax.random.normal(kh2, (B, C_LC, T2), dtype=jnp.float32)
    out_t = jax.block_until_ready(fftnet_block_forward(x2, params, SHIFT, h=h2, t_tile=512))
    ref_t = fftnet_block_reference(x2, params, SHIFT, h=h2)
    np.testing.assert_allclose(np.asarray(out_t), np.asarray(ref_t), rtol=1e-5, atol=1e-5)

    # --- batch == 1: T tile auto-capped so the grid keeps >= 2 parallel steps
    T3 = 258                        # t_eff = 256 -> tt = 128, n_t = 2, partial "next" block
    x3 = jax.random.normal(kx3, (1, C_IN, T3), dtype=jnp.float32)
    h3 = jax.random.normal(kh3, (1, C_LC, T3), dtype=jnp.float32)
    out_b1 = jax.block_until_ready(fftnet_block_forward(x3, params, SHIFT, h=h3))
    ref_b1 = fftnet_block_reference(x3, params, SHIFT, h=h3)
    np.testing.assert_allclose(np.asarray(out_b1), np.asarray(ref_b1), rtol=1e-5, atol=1e-5)

    # --- bf16 producer/consumer: bf16 in, bf16 out, f32 accumulate -----------
    out_bf16 = jax.block_until_ready(
        fftnet_block_forward(x2.astype(jnp.bfloat16), params, SHIFT,
                             h=h2.astype(jnp.bfloat16), t_tile=512))
    assert out_bf16.dtype == jnp.bfloat16
    np.testing.assert_allclose(np.asarray(out_bf16.astype(jnp.float32)),
                               np.asarray(ref_t), rtol=1e-1, atol=2e-1)

    print("KERNEL_OK")
</pallas_src>

<mosaic_0001>
module attributes {stable_mosaic.version = 11 : i64} {
  func.func @kernel(%arg0: i32, %arg1: memref<1x4x16xf32, #tpu.memory_space<vmem>>, %arg2: memref<1x3x16xf32, #tpu.memory_space<vmem>>, %arg3: memref<8x4xf32, #tpu.memory_space<vmem>>, %arg4: memref<8x4xf32, #tpu.memory_space<vmem>>, %arg5: memref<8x3xf32, #tpu.memory_space<vmem>>, %arg6: memref<8x3xf32, #tpu.memory_space<vmem>>, %arg7: memref<8x8xf32, #tpu.memory_space<vmem>>, %arg8: memref<8x1xf32, #tpu.memory_space<vmem>>, %arg9: memref<8x1xf32, #tpu.memory_space<vmem>>, %arg10: memref<1x8x14xf32, #tpu.memory_space<vmem>>) attributes {dimension_semantics = [#tpu.dimension_semantics<parallel>], iteration_bounds = array<i64: 2>, scalar_prefetch = 0 : i64, scratch_operands = 0 : i64, tpu.core_type = #tpu.core_type<tc>, window_params = [{transform_indices = @transform_0, window_bounds = array<i64: 1, 4, 16>}, {transform_indices = @transform_1, window_bounds = array<i64: 1, 3, 16>}, {pipeline_mode = #tpu.pipeline_mode<synchronous>, transform_indices = @transform_2, window_bounds = array<i64: 8, 4>}, {pipeline_mode = #tpu.pipeline_mode<synchronous>, transform_indices = @transform_3, window_bounds = array<i64: 8, 4>}, {pipeline_mode = #tpu.pipeline_mode<synchronous>, transform_indices = @transform_4, window_bounds = array<i64: 8, 3>}, {pipeline_mode = #tpu.pipeline_mode<synchronous>, transform_indices = @transform_5, window_bounds = array<i64: 8, 3>}, {pipeline_mode = #tpu.pipeline_mode<synchronous>, transform_indices = @transform_6, window_bounds = array<i64: 8, 8>}, {pipeline_mode = #tpu.pipeline_mode<synchronous>, transform_indices = @transform_7, window_bounds = array<i64: 8, 1>}, {pipeline_mode = #tpu.pipeline_mode<synchronous>, transform_indices = @transform_8, window_bounds = array<i64: 8, 1>}, {transform_indices = @transform_9, window_bounds = array<i64: 1, 8, 14>}]} {
    %c0 = arith.constant 0 : index
    %c0_0 = arith.constant 0 : index
    %c0_1 = arith.constant 0 : index
    %0 = vector.load %arg1[%c0, %c0_0, %c0_1] : memref<1x4x16xf32, #tpu.memory_space<vmem>>, vector<1x4x16xf32>
    %1 = vector.shape_cast %0 : vector<1x4x16xf32> to vector<4x16xf32>
    %c0_2 = arith.constant 0 : index
    %c0_3 = arith.constant 0 : index
    %c0_4 = arith.constant 0 : index
    %2 = vector.load %arg2[%c0_2, %c0_3, %c0_4] : memref<1x3x16xf32, #tpu.memory_space<vmem>>, vector<1x3x16xf32>
    %3 = vector.shape_cast %2 : vector<1x3x16xf32> to vector<3x16xf32>
    %c0_5 = arith.constant 0 : index
    %c0_6 = arith.constant 0 : index
    %4 = vector.load %arg3[%c0_5, %c0_6] : memref<8x4xf32, #tpu.memory_space<vmem>>, vector<8x4xf32>
    %5 = vector.extract_strided_slice %1 {offsets = [0, 0], sizes = [4, 14], strides = [1, 1]} : vector<4x16xf32> to vector<4x14xf32>
    %cst = arith.constant dense<0.000000e+00> : vector<8x14xf32>
    %6 = tpu.matmul %4, %5, %cst {dimension_numbers = #tpu.dot_dimension_numbers<[1], [0], [0], [1], [0, 0, 1, 1], [], []>} : vector<8x4xf32>, vector<4x14xf32>, vector<8x14xf32> -> vector<8x14xf32>
    %c0_7 = arith.constant 0 : index
    %c0_8 = arith.constant 0 : index
    %7 = vector.load %arg4[%c0_7, %c0_8] : memref<8x4xf32, #tpu.memory_space<vmem>>, vector<8x4xf32>
    %8 = vector.extract_strided_slice %1 {offsets = [0, 2], sizes = [4, 14], strides = [1, 1]} : vector<4x16xf32> to vector<4x14xf32>
    %cst_9 = arith.constant dense<0.000000e+00> : vector<8x14xf32>
    %9 = tpu.matmul %7, %8, %cst_9 {dimension_numbers = #tpu.dot_dimension_numbers<[1], [0], [0], [1], [0, 0, 1, 1], [], []>} : vector<8x4xf32>, vector<4x14xf32>, vector<8x14xf32> -> vector<8x14xf32>
    %10 = arith.addf %6, %9 : vector<8x14xf32>
    %c0_10 = arith.constant 0 : index
    %c0_11 = arith.constant 0 : index
    %11 = vector.load %arg5[%c0_10, %c0_11] : memref<8x3xf32, #tpu.memory_space<vmem>>, vector<8x3xf32>
    %12 = vector.extract_strided_slice %3 {offsets = [0, 0], sizes = [3, 14], strides = [1, 1]} : vector<3x16xf32> to vector<3x14xf32>
    %cst_12 = arith.constant dense<0.000000e+00> : vector<8x14xf32>
    %13 = tpu.matmul %11, %12, %cst_12 {dimension_numbers = #tpu.dot_dimension_numbers<[1], [0], [0], [1], [0, 0, 1, 1], [], []>} : vector<8x3xf32>, vector<3x14xf32>, vector<8x14xf32> -> vector<8x14xf32>
    %14 = arith.addf %10, %13 : vector<8x14xf32>
    %c0_13 = arith.constant 0 : index
    %c0_14 = arith.constant 0 : index
    %15 = vector.load %arg6[%c0_13, %c0_14] : memref<8x3xf32, #tpu.memory_space<vmem>>, vector<8x3xf32>
    %16 = vector.extract_strided_slice %3 {offsets = [0, 2], sizes = [3, 14], strides = [1, 1]} : vector<3x16xf32> to vector<3x14xf32>
    %cst_15 = arith.constant dense<0.000000e+00> : vector<8x14xf32>
    %17 = tpu.matmul %15, %16, %cst_15 {dimension_numbers = #tpu.dot_dimension_numbers<[1], [0], [0], [1], [0, 0, 1, 1], [], []>} : vector<8x3xf32>, vector<3x14xf32>, vector<8x14xf32> -> vector<8x14xf32>
    %18 = arith.addf %14, %17 : vector<8x14xf32>
    %c0_16 = arith.constant 0 : index
    %c0_17 = arith.constant 0 : index
    %19 = vector.load %arg8[%c0_16, %c0_17] : memref<8x1xf32, #tpu.memory_space<vmem>>, vector<8x1xf32>
    %20 = vector.broadcast %19 : vector<8x1xf32> to vector<8x14xf32>
    %21 = arith.addf %18, %20 : vector<8x14xf32>
    %cst_18 = arith.constant 0.000000e+00 : f32
    %22 = vector.broadcast %cst_18 : f32 to vector<8x14xf32>
    %23 = arith.maximumf %21, %22 : vector<8x14xf32>
    %c0_19 = arith.constant 0 : index
    %c0_20 = arith.constant 0 : index
    %24 = vector.load %arg7[%c0_19, %c0_20] : memref<8x8xf32, #tpu.memory_space<vmem>>, vector<8x8xf32>
    %cst_21 = arith.constant dense<0.000000e+00> : vector<8x14xf32>
    %25 = tpu.matmul %24, %23, %cst_21 {dimension_numbers = #tpu.dot_dimension_numbers<[1], [0], [0], [1], [0, 0, 1, 1], [], []>} : vector<8x8xf32>, vector<8x14xf32>, vector<8x14xf32> -> vector<8x14xf32>
    %c0_22 = arith.constant 0 : index
    %c0_23 = arith.constant 0 : index
    %26 = vector.load %arg9[%c0_22, %c0_23] : memref<8x1xf32, #tpu.memory_space<vmem>>, vector<8x1xf32>
    %27 = vector.broadcast %26 : vector<8x1xf32> to vector<8x14xf32>
    %28 = arith.addf %25, %27 : vector<8x14xf32>
    %cst_24 = arith.constant 0.000000e+00 : f32
    %29 = vector.broadcast %cst_24 : f32 to vector<8x14xf32>
    %30 = arith.maximumf %28, %29 : vector<8x14xf32>
    %c0_25 = arith.constant 0 : index
    %c0_26 = arith.constant 0 : index
    %c0_27 = arith.constant 0 : index
    %31 = vector.load %arg10[%c0_25, %c0_26, %c0_27] : memref<1x8x14xf32, #tpu.memory_space<vmem>>, vector<1x8x14xf32>
    %32 = vector.shape_cast %31 : vector<1x8x14xf32> to vector<8x14xf32>
    %33 = vector.shape_cast %30 : vector<8x14xf32> to vector<1x8x14xf32>
    tpu.vector_store %arg10[%c0_25, %c0_26, %c0_27], %33 {strides = array<i32>} : memref<1x8x14xf32, #tpu.memory_space<vmem>>, vector<1x8x14xf32>,
    return
  }
  func.func @transform_0(%arg0: i32) -> (i32, i32, i32) {
    %c0_i32 = arith.constant 0 : i32
    %c0_i32_0 = arith.constant 0 : i32
    %c0_i32_1 = arith.constant 0 : i32
    return %arg0, %c0_i32, %c0_i32_0 : i32, i32, i32
  }
  func.func @transform_1(%arg0: i32) -> (i32, i32, i32) {
    %c0_i32 = arith.constant 0 : i32
    %c0_i32_0 = arith.constant 0 : i32
    %c0_i32_1 = arith.constant 0 : i32
    return %arg0, %c0_i32, %c0_i32_0 : i32, i32, i32
  }
  func.func @transform_2(%arg0: i32) -> (i32, i32) {
    %c0_i32 = arith.constant 0 : i32
    %c0_i32_0 = arith.constant 0 : i32
    %c0_i32_1 = arith.constant 0 : i32
    return %c0_i32, %c0_i32_0 : i32, i32
  }
  func.func @transform_3(%arg0: i32) -> (i32, i32) {
    %c0_i32 = arith.constant 0 : i32
    %c0_i32_0 = arith.constant 0 : i32
    %c0_i32_1 = arith.constant 0 : i32
    return %c0_i32, %c0_i32_0 : i32, i32
  }
  func.func @transform_4(%arg0: i32) -> (i32, i32) {
    %c0_i32 = arith.constant 0 : i32
    %c0_i32_0 = arith.constant 0 : i32
    %c0_i32_1 = arith.constant 0 : i32
    return %c0_i32, %c0_i32_0 : i32, i32
  }
  func.func @transform_5(%arg0: i32) -> (i32, i32) {
    %c0_i32 = arith.constant 0 : i32
    %c0_i32_0 = arith.constant 0 : i32
    %c0_i32_1 = arith.constant 0 : i32
    return %c0_i32, %c0_i32_0 : i32, i32
  }
  func.func @transform_6(%arg0: i32) -> (i32, i32) {
    %c0_i32 = arith.constant 0 : i32
    %c0_i32_0 = arith.constant 0 : i32
    %c0_i32_1 = arith.constant 0 : i32
    return %c0_i32, %c0_i32_0 : i32, i32
  }
  func.func @transform_7(%arg0: i32) -> (i32, i32) {
    %c0_i32 = arith.constant 0 : i32
    %c0_i32_0 = arith.constant 0 : i32
    %c0_i32_1 = arith.constant 0 : i32
    return %c0_i32, %c0_i32_0 : i32, i32
  }
  func.func @transform_8(%arg0: i32) -> (i32, i32) {
    %c0_i32 = arith.constant 0 : i32
    %c0_i32_0 = arith.constant 0 : i32
    %c0_i32_1 = arith.constant 0 : i32
    return %c0_i32, %c0_i32_0 : i32, i32
  }
  func.func @transform_9(%arg0: i32) -> (i32, i32, i32) {
    %c0_i32 = arith.constant 0 : i32
    %c0_i32_0 = arith.constant 0 : i32
    %c0_i32_1 = arith.constant 0 : i32
    return %arg0, %c0_i32, %c0_i32_0 : i32, i32, i32
  }
}

</mosaic_0001>

<bundles_post_ra>
// kernel: tpu_custom_call.1
= control target key start
LH: loop header
LB: loop body
LE: loop exit
PB: predicated region body
PF: predicated region fallthrough
CT: control target
= control target key end

     0   :  { %14 = vsyncpa [#allocation3], 0  ;;  %s1177_s0 = inlined_call_operand.vmem [shape: f32[2,4,16], index: 0, kind: input, shape index: {}]   ;;  %s1178_s1 = inlined_call_operand.vmem [shape: f32[2,3,16], index: 1, kind: input, shape index: {}]   ;;  %s1179_s2 = inlined_call_operand.vmem [shape: f32[8,4], index: 2, kind: input, shape index: {}]   ;;  %s1180_s3 = inlined_call_operand.vmem [shape: f32[8,4], index: 3, kind: input, shape index: {}]   ;;  %s1181_s4 = inlined_call_operand.vmem [shape: f32[8,3], index: 4, kind: input, shape index: {}]   ;;  %s1182_s5 = inlined_call_operand.vmem [shape: f32[8,3], index: 5, kind: input, shape index: {}]   ;;  %s1183_s6 = inlined_call_operand.vmem [shape: f32[8,8], index: 6, kind: input, shape index: {}]   ;;  %s1184_s7 = inlined_call_operand.vmem [shape: f32[8,1], index: 7, kind: input, shape index: {}]   ;;  %s1185_s8 = inlined_call_operand.vmem [shape: f32[8,1], index: 8, kind: input, shape index: {}]   ;;  %s1186_s9 = inlined_call_operand.hbm [shape: f32[2,8,14], index: 9, kind: output, shape index: {}]  }
   0x1   :  { %16 = vsyncpa [#allocation3 + $0x1], 0  ;;  %s1057_s30 = smov 0   ;;  %s1059_s10 = smov 0  }
   0x2   :  { %s1061_s11 = smov 0   ;;  %s1063_s12 = smov 0  }
   0x3 LB: > { %s1078_s13 = sadd.s32 4294967295, %s1000_s12   ;;  %s840_s14 = sadd.s32 4294967294, %s1000_s12   ;;  %s1000_s12 = sphi %s1063_s12, %s1192_s12   ;;  %s996_s11 = sphi %s1061_s11, %s1191_s11   ;;  %s992_s10 = sphi %s1059_s10, %s1190_s10   ;;  %s988_s30 = sphi %s1057_s30, %s1189_s30  }
   0x4   : > { %s1082_s15 = sadd.s32 1, %s1000_s12   ;;  %s228_s16 = sadd.s32 1, %s996_s11 }
   0x5   : > { %s225_s17 = ssub.s32 %s1000_s12, %s1082_s15  ;;  %p238_p0 = scmp.ne.s32.totalorder %s996_s11, %s992_s10 }
   0x6   : > { %p226_p1 = scmp.eq.s32.totalorder %s225_s17, 0  ;;  %p239_p2 = scmp.eq.s32.totalorder %s1078_s13, 1 }
   0x7   : > { %p244_p3 = scmp.ne.s32.totalorder %s992_s10, %s988_s30  ;;  %p245_p4 = scmp.eq.s32.totalorder %s840_s14, 1 }
   0x8   : > { %s1093_s18 = scalar_select %p226_p1, %s996_s11, %s228_s16  }
   0x9   : > { %p1095_p5 = por %p239_p2, %p238_p0  ;;  %p1099_p6 = por %p245_p4, %p244_p3 }
   0xa   : > { %p843_p7 = scmp.ge.s32.totalorder %s1000_s12, 1  ;;  %p298_p8 = scmp.lt.s32.totalorder %s1000_s12, 3 }
   0xc   : > { %p299_p9 = pnand %p843_p7, %p298_p8 }
   0xd   : > { %p337_p10 = scmp.lt.s32.totalorder (!%p299_p9), %s1078_s13, 1  ;;  %s334_s17 = sand.u32 (!%p299_p9), 1, %s992_s10  }
   0xe   : > { %302 = sbr.rel (%p299_p9) target bundleno = 556 (0x22c), region = 56  ;;  %s844_s22 = sshll.u32 (!%p299_p9), %s334_s17, 3 }
   0xf   : > { %s857_s23 = sshll.u32 (!%p299_p9), %s1078_s13, 7  ;;  %s756_s28 = scalar_lea.sflag (!%p299_p9), [#allocation3], %s334_s17 }
  0x13   : > { %v1002_v0 = vmov 0.0   ;;  %s338_s21 = scalar_select %p337_p10, %s1078_s13, 1  ;;  %vm1003_vm0 = vmmov 0   ;;  %v663_v1 = vld [vmem:[%s1184_s7] sm:$0xff]  ;;  %v1004_v2 = vmov 0   ;;  %vm356_vm1 = vcmask 1043456  }
  0x14   : > { %870 = vmatprep.subr.mxu0 %v1002_v0  ;;  %875 = vmatprep.subr.mxu1 %v1002_v0  ;;  %vm352_vm2 = vcmask 31744   ;;  %v347_v3 = vld [vmem:[%s1179_s2] sm:$0xff]  ;;  %vm509_vm3 = vcmask 1042432   ;;  %vm505_vm4 = vcmask 23552   ;;  %vm678_vm5 = vcmask 64512  }
  0x15   : > { %872 = vmatprep.mubr.msk.f32.mxu0 %vm1003_vm0, %v1002_v0  ;;  %877 = vmatprep.mubr.msk.f32.mxu1 %vm1003_vm0, %v1002_v0  ;;  %s845_s24 = sshll.u32 %s338_s21, 2  ;;  %v672_v5 = vld [vmem:[%s1185_s8] sm:$0xff]  ;;  %s1005_s21 = smov 126   ;;  %vm753_vm6 = vcmask 113664  }
  0x16   : > { %938 = vset.pattern.permute.xlu1 %v1004_v2  ;;  %939 = vset.pattern.permute.xlu0 %v1004_v2  ;;  %s340_s27 = scalar_lea.vmem %s1177_s0, %s845_s24  ;;  %s344_s14 = scalar_lea.vmem %s1178_s1, %s845_s24  ;;  %v348_v7 = vld [vmem:[%s1180_s3] sm:$0xff] }
  0x17   : > { %666 = vperm.xlu1 %938, %v663_v1   ;;  %v345_v4 = vld [vmem:[%s340_s27] sm:$0xf]  ;;  %s767_s27 = scalar_lea.hbm %s1186_s9, %s857_s23 }
  0x18   : > { %350 = vrot.lane.b32.xlu0 %v345_v4, %s1005_s21  ;;  %876 = vmatpush3.msk.msra.mxu1 %vm356_vm1, %v345_v4  ;;  %v346_v6 = vld [vmem:[%s344_s14] sm:$0x7]  ;;  %s1006_s14 = smov [#allocation2]  }
  0x19   : > { %878 = vmatmul.mubr.msk.f32.vlgmr.msra.gmra.mxu1 %vm352_vm2, %v347_v3  ;;  %885 = vmatprep.subr.mxu1 %v1002_v0  ;;  %v504_v9 = vld [vmem:[%s1181_s4] sm:$0xff]  ;;  %s944_s13 = sshll.u32 %s1006_s14, 4  ;;  %s945_s13 = int_to_ptr.vmem [resolvable:$false] %s944_s13 }
  0x1a   : > { %887 = vmatprep.mubr.msk.f32.mxu1 %vm1003_vm0, %v1002_v0  ;;  %v584_v10 = vld [vmem:[%s1182_s5] sm:$0xff]  ;;  %s946_s16 = scalar_lea.vmem %s945_s13, 256 }
  0x1b   : > { %675 = vperm.xlu1 %938, %v672_v5   ;;  %v671_v26 = vld [vmem:[%s1183_s6] sm:$0xff] }
  0x1c   : > { %585 = vrot.lane.b32.xlu0 %v346_v6, %s1005_s21  ;;  %s336_s21 = scalar_lea.vmem [#allocation2], %s844_s22 }
  0x1d   : > { %s769_s24 = sshll.u32 %s336_s21, 4  ;;  %s770_s24 = int_to_ptr.vmem [resolvable:$true] %s769_s24 }
  0x1e   : > { %s940_s29 = scalar_lea.vmem %s770_s24, 128  ;;  %p947_p0 = scmp.lt.s32.totalorder %s770_s24, %s945_s13 }
  0x1f   : > { %p941_p11 = scmp.ne.s32.totalorder %s770_s24, %s940_s29  ;;  %p948_p1 = scmp.lt.s32.totalorder %s946_s16, %s940_s29 }
  0x21   : > { %p942_p12 = pnand %p941_p11, %p1095_p5  ;;  %p949_p2 = por %p948_p1, %p947_p0 }
  0x23   : > { %p943_p13 = pneg %p942_p12 }
  0x25   : > { %p950_p3 = pnand %p949_p2, %p943_p13 }
  0x8a   : > { %v351_v8 = vpop.permute.xlu0 %350 }
  0x8b   : > { %871 = vmatpush3.msk.msra.mxu0 %vm356_vm1, %v351_v8 }
  0x8c   : > { %873 = vmatmul.mubr.msk.f32.vlgmr.msra.gmra.mxu0 %vm352_vm2, %v348_v7  ;;  %880 = vmatprep.subr.mxu0 %v1002_v0 }
  0x8d   : > { %881 = vmatpush3.msk.msra.mxu0 %vm509_vm3, %v346_v6  ;;  %882 = vmatprep.mubr.msk.f32.mxu0 %vm1003_vm0, %v1002_v0 }
  0x8e   : > { %v586_v11 = vpop.permute.xlu0 %585  ;;  %890 = vmatprep.subr.mxu0 %v1002_v0 }
  0x8f   : > { %886 = vmatpush3.msk.msra.mxu1 %vm509_vm3, %v586_v11 }
  0x90   : > { %883 = vmatmul.mubr.msk.f32.vlgmr.msra.gmra.mxu0 %vm505_vm4, %v504_v9  ;;  %888 = vmatmul.mubr.msk.f32.vlgmr.msra.gmra.mxu1 %vm505_vm4, %v584_v10 }
  0x91   : > { %892 = vmatprep.mubr.msk.f32.mxu0 %vm1003_vm0, %v1002_v0 }
  0x92   : > { %v667_v23 = vpop.permute.xlu1 %666 }
  0x96   : > { %v676_v27 = vpop.permute.xlu1 %675 }
  0xd9   : > { %v500_v12 = vpop.f32.mrf.mxu1 }
  0xdb   : > { %v879_v13 = vpop.f32.mrf.mxu1 }
 0x14c   : > { %v425_v14 = vpop.f32.mrf.mxu0 }
 0x14d   : > { %v501_v16 = vadd.f32 %v500_v12, %v425_v14 }
 0x14e   : > { %v874_v15 = vpop.f32.mrf.mxu0 }
 0x150   : > { %v579_v17 = vpop.f32.mrf.mxu0  ;;  %v658_v18 = vpop.f32.mrf.mxu1 }
 0x151   : > { %v583_v19 = vadd.f32 %v579_v17, %v501_v16 }
 0x152   : > { %v884_v20 = vpop.f32.mrf.mxu0  ;;  %v889_v21 = vpop.f32.mrf.mxu1 }
 0x153   : > { %v662_v22 = vadd.f32 %v658_v18, %v583_v19 }
 0x155   : > { %v669_v24 = vadd.f32 %v667_v23, %v662_v22 }
 0x157   : > { %v670_v25 = vmax.f32 %v669_v24, 0.0 }
 0x159   : > { %891 = vmatpush3.msra.mxu0 %v670_v25 }
 0x15a   : > { %893 = vmatmul.mubr.msk.f32.vlgmr.msra.gmra.mxu0 %vm678_vm5, %v671_v26 }
 0x21a   : > { %v748_v28 = vpop.f32.mrf.mxu0 }
 0x21b   : > { %v749_v29 = vadd.f32 %v748_v28, %v676_v27 }
 0x21c   : > { %v894_v30 = vpop.f32.mrf.mxu0 }
 0x21d   : > { %v752_v31 = vmax.f32 %v749_v29, 0.0 }
 0x21f   : > { %754 = vst.msk [vmem:[%s336_s21] sm:$0xff] %vm753_vm6, %v752_v31 }
 0x220   : > { %953 = shalt.err (!%p950_p3)
}
 0x221   : > { %s954_s22 = scalar_lea.hbm %s767_s27, 128  ;;  %s958_s21 = scalar_lea.hbm %s1186_s9, 256 }
 0x222   : > { %p955_p4 = scmp.ne.s32.totalorder %s767_s27, %s954_s22  ;;  %p959_p9 = scmp.lt.s32.totalorder %s767_s27, %s1186_s9 }
 0x223   : > { %p960_p10 = scmp.lt.s32.totalorder %s958_s21, %s954_s22 }
 0x224   : > { %p956_p7 = pnand %p955_p4, %p1095_p5 }
 0x225   : > { %p961_p11 = por %p960_p10, %p959_p9 }
 0x226   : > { %p957_p8 = pneg %p956_p7 }
 0x228   : > { %p962_p12 = pnand %p961_p11, %p957_p8 }
 0x22a   : > { %965 = shalt.err (!%p962_p12)
}
 0x22b   : > { %895 = dma.vmem_to_hbm [thread:$0]  (%p1095_p5), %s770_s24, 128, %s767_s27, %s756_s28  }
 0x22c PF: > { %p901_p13 = scmp.ge.s32.totalorder %s1000_s12, 2  ;;  %s781_s29 = sand.u32 1, %s988_s30  }
 0x22d   : > { %s782_s14 = scalar_lea.sflag [#allocation3], %s781_s29 }
 0x22e   : > { %p898_p0 = pnand %p901_p13, %p1099_p6 }
 0x230   : > { %p899_p1 = pneg %p898_p0 }
 0x232   : > { %983 = dma.done.wait (%p899_p1), %s782_s14, 128  }
 0x233   : > { %985 = vsyncadd (%p899_p1), %s782_s14, 4294967168  ;;  %p19_p2 = scmp.ge.s32.totalorder %s1082_s15, 4   ;;  %s1189_s30 = smov %s992_s10 }
 0x234   : > { %s1190_s10 = smov %s996_s11  ;;  %s1191_s11 = smov %s1093_s18 }
 0x235   : > { %s1192_s12 = smov %s1082_s15  ;;  %21 = sbr.rel (!%p19_p2) target bundleno = 3 (0x3), region = 94 }
 0x23a   :  { %787 = vsyncpa [#allocation3], 1 }
 0x23b   :  { %789 = vsyncpa [#allocation3 + $0x1], 1 }

</bundles_post_ra>
